<compile_context>
chip_gen: v7x
topology: tpu7x:2x2x1
jax: 0.10.0
libtpu: 0.0.40
codegen_flags: <defaults>
</compile_context>

<pallas_src>
import functools
import math

import jax
import jax.numpy as jnp
from jax.experimental import pallas as pl
from jax.experimental.pallas import tpu as pltpu


def mha_kernel(q_ref, k_ref, v_ref, wq_ref, wk_ref, wv_ref, wo_ref, bo_ref,
               o_ref, *, num_heads):
    B, S, D = q_ref.shape
    H = num_heads
    d_k = D // H
    M = B * S
    scale = 1.0 / math.sqrt(d_k)

    # Flatten batch*seq (leading-dim reshape only; lanes untouched) so each
    # projection is a single (B*S, D) @ (D, D) MXU push with a D-deep
    # contraction.  3 pushes total for Q/K/V instead of 12 per-head pushes.
    q2 = q_ref[...].reshape(M, D)
    k2 = k_ref[...].reshape(M, D)
    v2 = v_ref[...].reshape(M, D)

    # Fold 1/sqrt(d_k) into Q (a (B*S, D) tensor), not the per-head scores.
    Qp = (jnp.dot(q2, wq_ref[...], preferred_element_type=jnp.float32)
          * scale).reshape(B, S, D)
    Kp = jnp.dot(k2, wk_ref[...],
                 preferred_element_type=jnp.float32).reshape(B, S, D)
    Vp = jnp.dot(v2, wv_ref[...],
                 preferred_element_type=jnp.float32).reshape(B, S, D)

    # Hoisted lane-index iota for the per-head column masks (computed once,
    # not per head / per loop body — broadcast_in_dim is not CSE'd by JAX).
    lane = jax.lax.broadcasted_iota(jnp.int32, (B, S, D), 2)

    # Per-head attention.  Selecting head columns with a mask keeps every
    # contraction full-width and avoids sub-128-lane slices / lane concat:
    #   scores_h = (Qp * mask_h) . Kp      (only head-h lanes contribute)
    #   attn_h @ (Vp * mask_h)             (lands in head-h columns, 0 elsewhere)
    # so summing over heads rebuilds the concatenated context directly.
    ctx = jnp.zeros((B, S, D), jnp.float32)
    for h in range(H):
        lo = h * d_k
        mask = (lane >= lo) & (lane < lo + d_k)

        Qh = jnp.where(mask, Qp, 0.0)
        # Q @ K^T as a batched contraction over the feature axis — no
        # transposed operand is materialized.
        scores = jnp.einsum('bqd,bkd->bqk', Qh, Kp,
                            preferred_element_type=jnp.float32)     # (B,S,S)

        # Numerically-stable softmax, all f32; approx reciprocal -> EUP slot.
        m = jnp.max(scores, axis=-1, keepdims=True)
        e = jnp.exp(scores - m)
        denom = jnp.sum(e, axis=-1, keepdims=True)
        attn = e * pl.reciprocal(denom, approx=True)
        # TODO(synk): optional attention mask and train-mode dropout from the
        #             PyTorch module are not implemented (eval mode, mask=None).

        Vh = jnp.where(mask, Vp, 0.0)
        ctx = ctx + jnp.einsum('bqk,bkd->bqd', attn, Vh,
                               preferred_element_type=jnp.float32)  # (B,S,D)

    # Single fused output projection (one MXU push) + bias; epilogue is one
    # add + cast + store.
    out = jnp.dot(ctx.reshape(M, D), wo_ref[...],
                  preferred_element_type=jnp.float32) + bo_ref[...]
    # TODO(synk): D=32 < 128 lanes -> masked vst here; production D should be a
    #             multiple of 128 for a lane-dense store.
    o_ref[...] = out.reshape(B, S, D).astype(o_ref.dtype)


def prepare_mha_params(wq_t, wk_t, wv_t, wo_t, bo):
    """One-time parameter layout prep (hoisted out of the per-call path).

    w*_t are the nn.Linear weights pre-transposed to [in, out]; they are
    consumed by the kernel as-is.  Only the bias needs a (1, D) reshape.
    """
    return wq_t, wk_t, wv_t, wo_t, bo.reshape(1, -1)


def multi_head_attention(query, key, value, wq_t, wk_t, wv_t, wo_t, bo2,
                         *, num_heads):
    """query/key/value: (B, S, D) f32.  Weights pre-prepped via prepare_mha_params."""
    B, S, D = query.shape
    out_dtype = query.dtype

    kernel = functools.partial(mha_kernel, num_heads=num_heads)

    def full(shape):
        return pl.BlockSpec(shape, lambda i, _n=len(shape): (0,) * _n)

    return pl.pallas_call(
        kernel,
        out_shape=jax.ShapeDtypeStruct((B, S, D), out_dtype),
        grid=(1,),  # single grid step: whole (tiny) problem fused, 0.35us paid once
        in_specs=[full((B, S, D)), full((B, S, D)), full((B, S, D)),
                  full((D, D)), full((D, D)), full((D, D)), full((D, D)),
                  full((1, D))],
        out_specs=full((B, S, D)),
        compiler_params=pltpu.CompilerParams(
            dimension_semantics=("arbitrary",)),
    )(query, key, value, wq_t, wk_t, wv_t, wo_t, bo2)


def reference_mha(query, key, value, wq_t, wk_t, wv_t, wo_t, bo, *, num_heads):
    """Pure-JAX reference mirroring the PyTorch forward (eval mode, mask=None)."""
    B, S, D = query.shape
    d_k = D // num_heads
    Q = (query @ wq_t).reshape(B, S, num_heads, d_k).transpose(0, 2, 1, 3)
    K = (key @ wk_t).reshape(B, S, num_heads, d_k).transpose(0, 2, 1, 3)
    V = (value @ wv_t).reshape(B, S, num_heads, d_k).transpose(0, 2, 1, 3)
    scores = jnp.einsum("bhqd,bhkd->bhqk", Q, K) / math.sqrt(d_k)
    attn = jax.nn.softmax(scores, axis=-1)
    ctx = jnp.einsum("bhqk,bhkd->bhqd", attn, V)
    ctx = ctx.transpose(0, 2, 1, 3).reshape(B, S, D)
    return ctx @ wo_t + bo


if __name__ == "__main__":
    # Small shapes consistent with the module's forward.
    B, S, d_model, num_heads = 2, 8, 32, 4

    key = jax.random.PRNGKey(0)
    ks = jax.random.split(key, 8)
    bound = 1.0 / math.sqrt(d_model)

    # Deterministic parameter init (shapes match nn.Linear(d_model, d_model)),
    # stored pre-transposed as [in, out].
    wq_t = jax.random.uniform(ks[0], (d_model, d_model), jnp.float32, -bound, bound)
    wk_t = jax.random.uniform(ks[1], (d_model, d_model), jnp.float32, -bound, bound)
    wv_t = jax.random.uniform(ks[2], (d_model, d_model), jnp.float32, -bound, bound)
    wo_t = jax.random.uniform(ks[3], (d_model, d_model), jnp.float32, -bound, bound)
    bo = jax.random.uniform(ks[4], (d_model,), jnp.float32, -bound, bound)

    query = jax.random.normal(ks[5], (B, S, d_model), jnp.float32)
    key_in = jax.random.normal(ks[6], (B, S, d_model), jnp.float32)
    value = jax.random.normal(ks[7], (B, S, d_model), jnp.float32)

    # One-time (per module) parameter prep, hoisted out of the per-call path.
    pwq, pwk, pwv, pwo, pbo = prepare_mha_params(wq_t, wk_t, wv_t, wo_t, bo)

    ref = reference_mha(query, key_in, value, wq_t, wk_t, wv_t, wo_t, bo,
                        num_heads=num_heads)

    # f32-only compute path (bf16 is a wash-to-loss at these shapes, esp. v5e).
    out = multi_head_attention(query, key_in, value, pwq, pwk, pwv, pwo, pbo,
                               num_heads=num_heads)
    out = jax.block_until_ready(out)
    assert out.shape == (B, S, d_model)
    # Tolerance loosened only for the approx EUP reciprocal in the softmax.
    assert jnp.allclose(out, ref, atol=5e-3, rtol=5e-3), \
        "kernel mismatch vs JAX reference"

    print("KERNEL_OK")
</pallas_src>

<mosaic_0001>
module attributes {stable_mosaic.version = 11 : i64} {
  func.func @mha_kernel(%arg0: i32, %arg1: memref<2x8x32xf32, #tpu.memory_space<vmem>>, %arg2: memref<2x8x32xf32, #tpu.memory_space<vmem>>, %arg3: memref<2x8x32xf32, #tpu.memory_space<vmem>>, %arg4: memref<32x32xf32, #tpu.memory_space<vmem>>, %arg5: memref<32x32xf32, #tpu.memory_space<vmem>>, %arg6: memref<32x32xf32, #tpu.memory_space<vmem>>, %arg7: memref<32x32xf32, #tpu.memory_space<vmem>>, %arg8: memref<1x32xf32, #tpu.memory_space<vmem>>, %arg9: memref<2x8x32xf32, #tpu.memory_space<vmem>>) attributes {dimension_semantics = [#tpu.dimension_semantics<arbitrary>], iteration_bounds = array<i64: 1>, scalar_prefetch = 0 : i64, scratch_operands = 0 : i64, tpu.core_type = #tpu.core_type<tc>, window_params = [{pipeline_mode = #tpu.pipeline_mode<synchronous>, transform_indices = @transform_0, window_bounds = array<i64: 2, 8, 32>}, {pipeline_mode = #tpu.pipeline_mode<synchronous>, transform_indices = @transform_1, window_bounds = array<i64: 2, 8, 32>}, {pipeline_mode = #tpu.pipeline_mode<synchronous>, transform_indices = @transform_2, window_bounds = array<i64: 2, 8, 32>}, {pipeline_mode = #tpu.pipeline_mode<synchronous>, transform_indices = @transform_3, window_bounds = array<i64: 32, 32>}, {pipeline_mode = #tpu.pipeline_mode<synchronous>, transform_indices = @transform_4, window_bounds = array<i64: 32, 32>}, {pipeline_mode = #tpu.pipeline_mode<synchronous>, transform_indices = @transform_5, window_bounds = array<i64: 32, 32>}, {pipeline_mode = #tpu.pipeline_mode<synchronous>, transform_indices = @transform_6, window_bounds = array<i64: 32, 32>}, {pipeline_mode = #tpu.pipeline_mode<synchronous>, transform_indices = @transform_7, window_bounds = array<i64: 1, 32>}, {pipeline_mode = #tpu.pipeline_mode<synchronous>, transform_indices = @transform_8, window_bounds = array<i64: 2, 8, 32>}]} {
    %c0 = arith.constant 0 : index
    %c0_0 = arith.constant 0 : index
    %c0_1 = arith.constant 0 : index
    %0 = vector.load %arg1[%c0, %c0_0, %c0_1] : memref<2x8x32xf32, #tpu.memory_space<vmem>>, vector<2x8x32xf32>
    %1 = vector.shape_cast %0 : vector<2x8x32xf32> to vector<16x32xf32>
    %c0_2 = arith.constant 0 : index
    %c0_3 = arith.constant 0 : index
    %c0_4 = arith.constant 0 : index
    %2 = vector.load %arg2[%c0_2, %c0_3, %c0_4] : memref<2x8x32xf32, #tpu.memory_space<vmem>>, vector<2x8x32xf32>
    %3 = vector.shape_cast %2 : vector<2x8x32xf32> to vector<16x32xf32>
    %c0_5 = arith.constant 0 : index
    %c0_6 = arith.constant 0 : index
    %c0_7 = arith.constant 0 : index
    %4 = vector.load %arg3[%c0_5, %c0_6, %c0_7] : memref<2x8x32xf32, #tpu.memory_space<vmem>>, vector<2x8x32xf32>
    %5 = vector.shape_cast %4 : vector<2x8x32xf32> to vector<16x32xf32>
    %c0_8 = arith.constant 0 : index
    %c0_9 = arith.constant 0 : index
    %6 = vector.load %arg4[%c0_8, %c0_9] : memref<32x32xf32, #tpu.memory_space<vmem>>, vector<32x32xf32>
    %cst = arith.constant dense<0.000000e+00> : vector<16x32xf32>
    %7 = tpu.matmul %1, %6, %cst {dimension_numbers = #tpu.dot_dimension_numbers<[1], [0], [0], [1], [0, 0, 1, 1], [], []>} : vector<16x32xf32>, vector<32x32xf32>, vector<16x32xf32> -> vector<16x32xf32>
    %cst_10 = arith.constant 0.353553385 : f32
    %8 = vector.broadcast %cst_10 : f32 to vector<16x32xf32>
    %9 = arith.mulf %7, %8 : vector<16x32xf32>
    %10 = vector.shape_cast %9 : vector<16x32xf32> to vector<2x8x32xf32>
    %c0_11 = arith.constant 0 : index
    %c0_12 = arith.constant 0 : index
    %11 = vector.load %arg5[%c0_11, %c0_12] : memref<32x32xf32, #tpu.memory_space<vmem>>, vector<32x32xf32>
    %cst_13 = arith.constant dense<0.000000e+00> : vector<16x32xf32>
    %12 = tpu.matmul %3, %11, %cst_13 {dimension_numbers = #tpu.dot_dimension_numbers<[1], [0], [0], [1], [0, 0, 1, 1], [], []>} : vector<16x32xf32>, vector<32x32xf32>, vector<16x32xf32> -> vector<16x32xf32>
    %13 = vector.shape_cast %12 : vector<16x32xf32> to vector<2x8x32xf32>
    %c0_14 = arith.constant 0 : index
    %c0_15 = arith.constant 0 : index
    %14 = vector.load %arg6[%c0_14, %c0_15] : memref<32x32xf32, #tpu.memory_space<vmem>>, vector<32x32xf32>
    %cst_16 = arith.constant dense<0.000000e+00> : vector<16x32xf32>
    %15 = tpu.matmul %5, %14, %cst_16 {dimension_numbers = #tpu.dot_dimension_numbers<[1], [0], [0], [1], [0, 0, 1, 1], [], []>} : vector<16x32xf32>, vector<32x32xf32>, vector<16x32xf32> -> vector<16x32xf32>
    %16 = vector.shape_cast %15 : vector<16x32xf32> to vector<2x8x32xf32>
    %17 = tpu.iota {dimensions = array<i32: 2>} : vector<2x8x32xi32>
    %cst_17 = arith.constant 0.000000e+00 : f32
    %18 = vector.broadcast %cst_17 : f32 to vector<2x8x32xf32>
    %c0_i32 = arith.constant 0 : i32
    %19 = vector.broadcast %c0_i32 : i32 to vector<2x8x32xi32>
    %20 = arith.cmpi sge, %17, %19 : vector<2x8x32xi32>
    %c8_i32 = arith.constant 8 : i32
    %21 = vector.broadcast %c8_i32 : i32 to vector<2x8x32xi32>
    %22 = arith.cmpi slt, %17, %21 : vector<2x8x32xi32>
    %23 = arith.andi %20, %22 : vector<2x8x32xi1>
    %cst_18 = arith.constant 0.000000e+00 : f32
    %24 = vector.broadcast %cst_18 : f32 to vector<2x8x32xf32>
    %25 = arith.select %23, %10, %24 : vector<2x8x32xi1>, vector<2x8x32xf32>
    "tpu.trace_start"() <{level = 10 : i32, message = "bqd,bkd->bqk"}> : () -> ()
    %cst_19 = arith.constant dense<0.000000e+00> : vector<2x8x8xf32>
    %26 = tpu.matmul %25, %13, %cst_19 {dimension_numbers = #tpu.dot_dimension_numbers<[2], [2], [1], [1], [0, 0, 0, 1, 1, 1], [0], [0]>} : vector<2x8x32xf32>, vector<2x8x32xf32>, vector<2x8x8xf32> -> vector<2x8x8xf32>
    "tpu.trace_stop"() : () -> ()
    %cst_20 = arith.constant dense<0xFF800000> : vector<2x8xf32>
    %27 = vector.multi_reduction <maximumf>, %26, %cst_20 [2] : vector<2x8x8xf32> to vector<2x8xf32>
    %28 = vector.shape_cast %27 : vector<2x8xf32> to vector<2x8x1xf32>
    %29 = vector.broadcast %28 : vector<2x8x1xf32> to vector<2x8x8xf32>
    %30 = arith.subf %26, %29 : vector<2x8x8xf32>
    %31 = math.exp %30 : vector<2x8x8xf32>
    %cst_21 = arith.constant dense<0.000000e+00> : vector<2x8xf32>
    %32 = vector.multi_reduction <add>, %31, %cst_21 [2] : vector<2x8x8xf32> to vector<2x8xf32>
    %33 = vector.shape_cast %32 : vector<2x8xf32> to vector<2x8x1xf32>
    %34 = tpu.reciprocal %33 {approx = true} : vector<2x8x1xf32> -> vector<2x8x1xf32>
    %35 = vector.broadcast %34 : vector<2x8x1xf32> to vector<2x8x8xf32>
    %36 = arith.mulf %31, %35 : vector<2x8x8xf32>
    %cst_22 = arith.constant 0.000000e+00 : f32
    %37 = vector.broadcast %cst_22 : f32 to vector<2x8x32xf32>
    %38 = arith.select %23, %16, %37 : vector<2x8x32xi1>, vector<2x8x32xf32>
    "tpu.trace_start"() <{level = 10 : i32, message = "bqk,bkd->bqd"}> : () -> ()
    %cst_23 = arith.constant dense<0.000000e+00> : vector<2x8x32xf32>
    %39 = tpu.matmul %36, %38, %cst_23 {dimension_numbers = #tpu.dot_dimension_numbers<[2], [1], [1], [2], [0, 0, 0, 1, 1, 2], [0], [0]>} : vector<2x8x8xf32>, vector<2x8x32xf32>, vector<2x8x32xf32> -> vector<2x8x32xf32>
    "tpu.trace_stop"() : () -> ()
    %40 = arith.addf %18, %39 : vector<2x8x32xf32>
    %c8_i32_24 = arith.constant 8 : i32
    %41 = vector.broadcast %c8_i32_24 : i32 to vector<2x8x32xi32>
    %42 = arith.cmpi sge, %17, %41 : vector<2x8x32xi32>
    %c16_i32 = arith.constant 16 : i32
    %43 = vector.broadcast %c16_i32 : i32 to vector<2x8x32xi32>
    %44 = arith.cmpi slt, %17, %43 : vector<2x8x32xi32>
    %45 = arith.andi %42, %44 : vector<2x8x32xi1>
    %cst_25 = arith.constant 0.000000e+00 : f32
    %46 = vector.broadcast %cst_25 : f32 to vector<2x8x32xf32>
    %47 = arith.select %45, %10, %46 : vector<2x8x32xi1>, vector<2x8x32xf32>
    "tpu.trace_start"() <{level = 10 : i32, message = "bqd,bkd->bqk"}> : () -> ()
    %cst_26 = arith.constant dense<0.000000e+00> : vector<2x8x8xf32>
    %48 = tpu.matmul %47, %13, %cst_26 {dimension_numbers = #tpu.dot_dimension_numbers<[2], [2], [1], [1], [0, 0, 0, 1, 1, 1], [0], [0]>} : vector<2x8x32xf32>, vector<2x8x32xf32>, vector<2x8x8xf32> -> vector<2x8x8xf32>
    "tpu.trace_stop"() : () -> ()
    %cst_27 = arith.constant dense<0xFF800000> : vector<2x8xf32>
    %49 = vector.multi_reduction <maximumf>, %48, %cst_27 [2] : vector<2x8x8xf32> to vector<2x8xf32>
    %50 = vector.shape_cast %49 : vector<2x8xf32> to vector<2x8x1xf32>
    %51 = vector.broadcast %50 : vector<2x8x1xf32> to vector<2x8x8xf32>
    %52 = arith.subf %48, %51 : vector<2x8x8xf32>
    %53 = math.exp %52 : vector<2x8x8xf32>
    %cst_28 = arith.constant dense<0.000000e+00> : vector<2x8xf32>
    %54 = vector.multi_reduction <add>, %53, %cst_28 [2] : vector<2x8x8xf32> to vector<2x8xf32>
    %55 = vector.shape_cast %54 : vector<2x8xf32> to vector<2x8x1xf32>
    %56 = tpu.reciprocal %55 {approx = true} : vector<2x8x1xf32> -> vector<2x8x1xf32>
    %57 = vector.broadcast %56 : vector<2x8x1xf32> to vector<2x8x8xf32>
    %58 = arith.mulf %53, %57 : vector<2x8x8xf32>
    %cst_29 = arith.constant 0.000000e+00 : f32
    %59 = vector.broadcast %cst_29 : f32 to vector<2x8x32xf32>
    %60 = arith.select %45, %16, %59 : vector<2x8x32xi1>, vector<2x8x32xf32>
    "tpu.trace_start"() <{level = 10 : i32, message = "bqk,bkd->bqd"}> : () -> ()
    %cst_30 = arith.constant dense<0.000000e+00> : vector<2x8x32xf32>
    %61 = tpu.matmul %58, %60, %cst_30 {dimension_numbers = #tpu.dot_dimension_numbers<[2], [1], [1], [2], [0, 0, 0, 1, 1, 2], [0], [0]>} : vector<2x8x8xf32>, vector<2x8x32xf32>, vector<2x8x32xf32> -> vector<2x8x32xf32>
    "tpu.trace_stop"() : () -> ()
    %62 = arith.addf %40, %61 : vector<2x8x32xf32>
    %c16_i32_31 = arith.constant 16 : i32
    %63 = vector.broadcast %c16_i32_31 : i32 to vector<2x8x32xi32>
    %64 = arith.cmpi sge, %17, %63 : vector<2x8x32xi32>
    %c24_i32 = arith.constant 24 : i32
    %65 = vector.broadcast %c24_i32 : i32 to vector<2x8x32xi32>
    %66 = arith.cmpi slt, %17, %65 : vector<2x8x32xi32>
    %67 = arith.andi %64, %66 : vector<2x8x32xi1>
    %cst_32 = arith.constant 0.000000e+00 : f32
    %68 = vector.broadcast %cst_32 : f32 to vector<2x8x32xf32>
    %69 = arith.select %67, %10, %68 : vector<2x8x32xi1>, vector<2x8x32xf32>
    "tpu.trace_start"() <{level = 10 : i32, message = "bqd,bkd->bqk"}> : () -> ()
    %cst_33 = arith.constant dense<0.000000e+00> : vector<2x8x8xf32>
    %70 = tpu.matmul %69, %13, %cst_33 {dimension_numbers = #tpu.dot_dimension_numbers<[2], [2], [1], [1], [0, 0, 0, 1, 1, 1], [0], [0]>} : vector<2x8x32xf32>, vector<2x8x32xf32>, vector<2x8x8xf32> -> vector<2x8x8xf32>
    "tpu.trace_stop"() : () -> ()
    %cst_34 = arith.constant dense<0xFF800000> : vector<2x8xf32>
    %71 = vector.multi_reduction <maximumf>, %70, %cst_34 [2] : vector<2x8x8xf32> to vector<2x8xf32>
    %72 = vector.shape_cast %71 : vector<2x8xf32> to vector<2x8x1xf32>
    %73 = vector.broadcast %72 : vector<2x8x1xf32> to vector<2x8x8xf32>
    %74 = arith.subf %70, %73 : vector<2x8x8xf32>
    %75 = math.exp %74 : vector<2x8x8xf32>
    %cst_35 = arith.constant dense<0.000000e+00> : vector<2x8xf32>
    %76 = vector.multi_reduction <add>, %75, %cst_35 [2] : vector<2x8x8xf32> to vector<2x8xf32>
    %77 = vector.shape_cast %76 : vector<2x8xf32> to vector<2x8x1xf32>
    %78 = tpu.reciprocal %77 {approx = true} : vector<2x8x1xf32> -> vector<2x8x1xf32>
    %79 = vector.broadcast %78 : vector<2x8x1xf32> to vector<2x8x8xf32>
    %80 = arith.mulf %75, %79 : vector<2x8x8xf32>
    %cst_36 = arith.constant 0.000000e+00 : f32
    %81 = vector.broadcast %cst_36 : f32 to vector<2x8x32xf32>
    %82 = arith.select %67, %16, %81 : vector<2x8x32xi1>, vector<2x8x32xf32>
    "tpu.trace_start"() <{level = 10 : i32, message = "bqk,bkd->bqd"}> : () -> ()
    %cst_37 = arith.constant dense<0.000000e+00> : vector<2x8x32xf32>
    %83 = tpu.matmul %80, %82, %cst_37 {dimension_numbers = #tpu.dot_dimension_numbers<[2], [1], [1], [2], [0, 0, 0, 1, 1, 2], [0], [0]>} : vector<2x8x8xf32>, vector<2x8x32xf32>, vector<2x8x32xf32> -> vector<2x8x32xf32>
    "tpu.trace_stop"() : () -> ()
    %84 = arith.addf %62, %83 : vector<2x8x32xf32>
    %c24_i32_38 = arith.constant 24 : i32
    %85 = vector.broadcast %c24_i32_38 : i32 to vector<2x8x32xi32>
    %86 = arith.cmpi sge, %17, %85 : vector<2x8x32xi32>
    %c32_i32 = arith.constant 32 : i32
    %87 = vector.broadcast %c32_i32 : i32 to vector<2x8x32xi32>
    %88 = arith.cmpi slt, %17, %87 : vector<2x8x32xi32>
    %89 = arith.andi %86, %88 : vector<2x8x32xi1>
    %cst_39 = arith.constant 0.000000e+00 : f32
    %90 = vector.broadcast %cst_39 : f32 to vector<2x8x32xf32>
    %91 = arith.select %89, %10, %90 : vector<2x8x32xi1>, vector<2x8x32xf32>
    "tpu.trace_start"() <{level = 10 : i32, message = "bqd,bkd->bqk"}> : () -> ()
    %cst_40 = arith.constant dense<0.000000e+00> : vector<2x8x8xf32>
    %92 = tpu.matmul %91, %13, %cst_40 {dimension_numbers = #tpu.dot_dimension_numbers<[2], [2], [1], [1], [0, 0, 0, 1, 1, 1], [0], [0]>} : vector<2x8x32xf32>, vector<2x8x32xf32>, vector<2x8x8xf32> -> vector<2x8x8xf32>
    "tpu.trace_stop"() : () -> ()
    %cst_41 = arith.constant dense<0xFF800000> : vector<2x8xf32>
    %93 = vector.multi_reduction <maximumf>, %92, %cst_41 [2] : vector<2x8x8xf32> to vector<2x8xf32>
    %94 = vector.shape_cast %93 : vector<2x8xf32> to vector<2x8x1xf32>
    %95 = vector.broadcast %94 : vector<2x8x1xf32> to vector<2x8x8xf32>
    %96 = arith.subf %92, %95 : vector<2x8x8xf32>
    %97 = math.exp %96 : vector<2x8x8xf32>
    %cst_42 = arith.constant dense<0.000000e+00> : vector<2x8xf32>
    %98 = vector.multi_reduction <add>, %97, %cst_42 [2] : vector<2x8x8xf32> to vector<2x8xf32>
    %99 = vector.shape_cast %98 : vector<2x8xf32> to vector<2x8x1xf32>
    %100 = tpu.reciprocal %99 {approx = true} : vector<2x8x1xf32> -> vector<2x8x1xf32>
    %101 = vector.broadcast %100 : vector<2x8x1xf32> to vector<2x8x8xf32>
    %102 = arith.mulf %97, %101 : vector<2x8x8xf32>
    %cst_43 = arith.constant 0.000000e+00 : f32
    %103 = vector.broadcast %cst_43 : f32 to vector<2x8x32xf32>
    %104 = arith.select %89, %16, %103 : vector<2x8x32xi1>, vector<2x8x32xf32>
    "tpu.trace_start"() <{level = 10 : i32, message = "bqk,bkd->bqd"}> : () -> ()
    %cst_44 = arith.constant dense<0.000000e+00> : vector<2x8x32xf32>
    %105 = tpu.matmul %102, %104, %cst_44 {dimension_numbers = #tpu.dot_dimension_numbers<[2], [1], [1], [2], [0, 0, 0, 1, 1, 2], [0], [0]>} : vector<2x8x8xf32>, vector<2x8x32xf32>, vector<2x8x32xf32> -> vector<2x8x32xf32>
    "tpu.trace_stop"() : () -> ()
    %106 = arith.addf %84, %105 : vector<2x8x32xf32>
    %107 = vector.shape_cast %106 : vector<2x8x32xf32> to vector<16x32xf32>
    %c0_45 = arith.constant 0 : index
    %c0_46 = arith.constant 0 : index
    %108 = vector.load %arg7[%c0_45, %c0_46] : memref<32x32xf32, #tpu.memory_space<vmem>>, vector<32x32xf32>
    %cst_47 = arith.constant dense<0.000000e+00> : vector<16x32xf32>
    %109 = tpu.matmul %107, %108, %cst_47 {dimension_numbers = #tpu.dot_dimension_numbers<[1], [0], [0], [1], [0, 0, 1, 1], [], []>} : vector<16x32xf32>, vector<32x32xf32>, vector<16x32xf32> -> vector<16x32xf32>
    %c0_48 = arith.constant 0 : index
    %c0_49 = arith.constant 0 : index
    %110 = vector.load %arg8[%c0_48, %c0_49] : memref<1x32xf32, #tpu.memory_space<vmem>>, vector<1x32xf32>
    %111 = vector.broadcast %110 : vector<1x32xf32> to vector<16x32xf32>
    %112 = arith.addf %109, %111 : vector<16x32xf32>
    %113 = vector.shape_cast %112 : vector<16x32xf32> to vector<2x8x32xf32>
    %c0_50 = arith.constant 0 : index
    %c0_51 = arith.constant 0 : index
    %c0_52 = arith.constant 0 : index
    %114 = vector.load %arg9[%c0_50, %c0_51, %c0_52] : memref<2x8x32xf32, #tpu.memory_space<vmem>>, vector<2x8x32xf32>
    tpu.vector_store %arg9[%c0_50, %c0_51, %c0_52], %113 {strides = array<i32>} : memref<2x8x32xf32, #tpu.memory_space<vmem>>, vector<2x8x32xf32>,
    return
  }
  func.func @transform_0(%arg0: i32) -> (i32, i32, i32) {
    %c0_i32 = arith.constant 0 : i32
    %c0_i32_0 = arith.constant 0 : i32
    %c0_i32_1 = arith.constant 0 : i32
    %c0_i32_2 = arith.constant 0 : i32
    return %c0_i32, %c0_i32_0, %c0_i32_1 : i32, i32, i32
  }
  func.func @transform_1(%arg0: i32) -> (i32, i32, i32) {
    %c0_i32 = arith.constant 0 : i32
    %c0_i32_0 = arith.constant 0 : i32
    %c0_i32_1 = arith.constant 0 : i32
    %c0_i32_2 = arith.constant 0 : i32
    return %c0_i32, %c0_i32_0, %c0_i32_1 : i32, i32, i32
  }
  func.func @transform_2(%arg0: i32) -> (i32, i32, i32) {
    %c0_i32 = arith.constant 0 : i32
    %c0_i32_0 = arith.constant 0 : i32
    %c0_i32_1 = arith.constant 0 : i32
    %c0_i32_2 = arith.constant 0 : i32
    return %c0_i32, %c0_i32_0, %c0_i32_1 : i32, i32, i32
  }
  func.func @transform_3(%arg0: i32) -> (i32, i32) {
    %c0_i32 = arith.constant 0 : i32
    %c0_i32_0 = arith.constant 0 : i32
    %c0_i32_1 = arith.constant 0 : i32
    return %c0_i32, %c0_i32_0 : i32, i32
  }
  func.func @transform_4(%arg0: i32) -> (i32, i32) {
    %c0_i32 = arith.constant 0 : i32
    %c0_i32_0 = arith.constant 0 : i32
    %c0_i32_1 = arith.constant 0 : i32
    return %c0_i32, %c0_i32_0 : i32, i32
  }
  func.func @transform_5(%arg0: i32) -> (i32, i32) {
    %c0_i32 = arith.constant 0 : i32
    %c0_i32_0 = arith.constant 0 : i32
    %c0_i32_1 = arith.constant 0 : i32
    return %c0_i32, %c0_i32_0 : i32, i32
  }
  func.func @transform_6(%arg0: i32) -> (i32, i32) {
    %c0_i32 = arith.constant 0 : i32
    %c0_i32_0 = arith.constant 0 : i32
    %c0_i32_1 = arith.constant 0 : i32
    return %c0_i32, %c0_i32_0 : i32, i32
  }
  func.func @transform_7(%arg0: i32) -> (i32, i32) {
    %c0_i32 = arith.constant 0 : i32
    %c0_i32_0 = arith.constant 0 : i32
    %c0_i32_1 = arith.constant 0 : i32
    return %c0_i32, %c0_i32_0 : i32, i32
  }
  func.func @transform_8(%arg0: i32) -> (i32, i32, i32) {
    %c0_i32 = arith.constant 0 : i32
    %c0_i32_0 = arith.constant 0 : i32
    %c0_i32_1 = arith.constant 0 : i32
    %c0_i32_2 = arith.constant 0 : i32
    return %c0_i32, %c0_i32_0, %c0_i32_1 : i32, i32, i32
  }
}

</mosaic_0001>

<bundles_post_ra>
// kernel: tpu_custom_call.1
= control target key start
LH: loop header
LB: loop body
LE: loop exit
PB: predicated region body
PF: predicated region fallthrough
CT: control target
= control target key end

     0   :  { %13 = vsyncpa [#allocation3], 0  ;;  %s2699_s0 = inlined_call_operand.hbm [shape: f32[2,8,32], index: 0, kind: input, shape index: {}]   ;;  %s2700_s1 = inlined_call_operand.hbm [shape: f32[2,8,32], index: 1, kind: input, shape index: {}]   ;;  %s2701_s2 = inlined_call_operand.hbm [shape: f32[2,8,32], index: 2, kind: input, shape index: {}]   ;;  %s2702_s3 = inlined_call_operand.hbm [shape: f32[32,32], index: 3, kind: input, shape index: {}]   ;;  %s2703_s4 = inlined_call_operand.hbm [shape: f32[32,32], index: 4, kind: input, shape index: {}]   ;;  %s2704_s5 = inlined_call_operand.hbm [shape: f32[32,32], index: 5, kind: input, shape index: {}]   ;;  %s2705_s6 = inlined_call_operand.hbm [shape: f32[32,32], index: 6, kind: input, shape index: {}]   ;;  %s2706_s7 = inlined_call_operand.vmem [shape: f32[1,32], index: 7, kind: input, shape index: {}]   ;;  %s2707_s8 = inlined_call_operand.hbm [shape: f32[2,8,32], index: 8, kind: output, shape index: {}]  }
   0x1   :  { %14 = vsyncpa [#allocation6], 0 }
   0x2   :  { %15 = vsyncpa [#allocation9], 0 }
   0x3   :  { %16 = vsyncpa [#allocation12], 0 }
   0x4   :  { %17 = vsyncpa [#allocation4], 0  ;;  %s2295_s27 = smov [#allocation5]   ;;  %s2296_s29 = smov [#allocation8]  }
   0x5   :  { %s35_s28 = sshll.u32 %s2295_s27, 4  ;;  %s59_s30 = sshll.u32 %s2296_s29, 4  ;;  %s36_s28 = int_to_ptr.vmem [resolvable:$true] %s35_s28  ;;  %s2352_s30 = int_to_ptr.vmem [resolvable:$true] %s59_s30 }
   0x6   :  { %s2109_s11 = scalar_lea.hbm %s2700_s1, 256 }
   0x7   :  { %p2110_p0 = scmp.ne.s32.totalorder %s2700_s1, %s2109_s11  ;;  %p2113_p1 = scmp.lt.u32.totalorder %s2109_s11, %s2700_s1 }
   0x9   :  { %p2115_p2 = pnand %p2113_p1, %p2110_p0 }
   0xb   :  { %2118 = shalt.err (!%p2115_p2)
}
   0xc   :  { %s2119_s16 = scalar_lea.vmem %s36_s28, 256  ;;  %p2124_p4 = scmp.lt.s32.totalorder %s36_s28, %s36_s28 }
   0xd   :  { %p2120_p3 = scmp.ne.s32.totalorder %s36_s28, %s2119_s16  ;;  %p2125_p5 = scmp.lt.s32.totalorder %s2119_s16, %s2119_s16 }
   0xf   :  { %p2126_p6 = por %p2125_p5, %p2124_p4 }
  0x11   :  { %p2127_p7 = pnand %p2126_p6, %p2120_p3 }
  0x13   :  { %2130 = shalt.err (!%p2127_p7)
}
  0x14   :  { %s2297_s17 = smov 128   ;;  %s2298_s18 = smov 8  }
  0x15   :  { %41 = dma.hbm_to_vmem [thread:$0]  %s2700_s1, 256, %s36_s28, [#allocation6], %s2297_s17, %s2297_s17, %s2298_s18  }
  0x16   :  { %s2131_s23 = scalar_lea.hbm %s2702_s3, 512 }
  0x17   :  { %p2132_p8 = scmp.ne.s32.totalorder %s2702_s3, %s2131_s23  ;;  %p2135_p9 = scmp.lt.u32.totalorder %s2131_s23, %s2702_s3 }
  0x19   :  { %p2137_p10 = pnand %p2135_p9, %p2132_p8 }
  0x1b   :  { %2140 = shalt.err (!%p2137_p10)
}
  0x1c   :  { %s2141_s29 = scalar_lea.vmem %s2352_s30, 512  ;;  %p2146_p12 = scmp.lt.s32.totalorder %s2352_s30, %s2352_s30 }
  0x1d   :  { %p2142_p11 = scmp.ne.s32.totalorder %s2352_s30, %s2141_s29  ;;  %p2147_p13 = scmp.lt.s32.totalorder %s2141_s29, %s2141_s29 }
  0x1f   :  { %p2148_p0 = por %p2147_p13, %p2146_p12 }
  0x21   :  { %p2149_p1 = pnand %p2148_p0, %p2142_p11 }
  0x23   :  { %2152 = shalt.err (!%p2149_p1)
}
  0x24   :  { %65 = dma.hbm_to_vmem [thread:$0]  %s2702_s3, 512, %s2352_s30, [#allocation9], %s2297_s17, %s2297_s17, %s2298_s18  }
  0x25   :  { %s2299_s9 = smov [#allocation11]   ;;  %s2300_s11 = smov [#allocation2]  }
  0x26   :  { %s83_s10 = sshll.u32 %s2299_s9, 4  ;;  %s23_s12 = sshll.u32 %s2300_s11, 4  ;;  %s84_s10 = int_to_ptr.vmem [resolvable:$true] %s83_s10  ;;  %s2389_s12 = int_to_ptr.vmem [resolvable:$true] %s23_s12 }
  0x27   :  { %s2153_s15 = scalar_lea.hbm %s2704_s5, 512 }
  0x28   :  { %p2154_p2 = scmp.ne.s32.totalorder %s2704_s5, %s2153_s15  ;;  %p2157_p3 = scmp.lt.u32.totalorder %s2153_s15, %s2704_s5 }
  0x2a   :  { %p2159_p4 = pnand %p2157_p3, %p2154_p2 }
  0x2c   :  { %2162 = shalt.err (!%p2159_p4)
}
  0x2d   :  { %s2163_s3 = scalar_lea.vmem %s84_s10, 512  ;;  %p2168_p6 = scmp.lt.s32.totalorder %s84_s10, %s84_s10 }
  0x2e   :  { %p2164_p5 = scmp.ne.s32.totalorder %s84_s10, %s2163_s3  ;;  %p2169_p7 = scmp.lt.s32.totalorder %s2163_s3, %s2163_s3 }
  0x30   :  { %p2170_p8 = por %p2169_p7, %p2168_p6 }
  0x32   :  { %p2171_p9 = pnand %p2170_p8, %p2164_p5 }
  0x34   :  { %2174 = shalt.err (!%p2171_p9)
}
  0x35   :  { %89 = dma.hbm_to_vmem [thread:$0]  %s2704_s5, 512, %s84_s10, [#allocation12], %s2297_s17, %s2297_s17, %s2298_s18  }
  0x36   :  { %s2175_s25 = scalar_lea.hbm %s2699_s0, 256 }
  0x37   :  { %p2176_p10 = scmp.ne.s32.totalorder %s2699_s0, %s2175_s25  ;;  %p2179_p11 = scmp.lt.u32.totalorder %s2175_s25, %s2699_s0 }
  0x39   :  { %p2181_p12 = pnand %p2179_p11, %p2176_p10 }
  0x3b   :  { %2184 = shalt.err (!%p2181_p12)
}
  0x3c   :  { %s2185_s28 = scalar_lea.vmem %s2389_s12, 256  ;;  %p2190_p0 = scmp.lt.s32.totalorder %s2389_s12, %s2389_s12 }
  0x3d   :  { %p2186_p13 = scmp.ne.s32.totalorder %s2389_s12, %s2185_s28  ;;  %p2191_p1 = scmp.lt.s32.totalorder %s2185_s28, %s2185_s28 }
  0x3f   :  { %p2192_p2 = por %p2191_p1, %p2190_p0 }
  0x41   :  { %p2193_p3 = pnand %p2192_p2, %p2186_p13 }
  0x43   :  { %2196 = shalt.err (!%p2193_p3)
}
  0x44   :  { %29 = dma.hbm_to_vmem [thread:$0]  %s2699_s0, 256, %s2389_s12, [#allocation3], %s2297_s17, %s2297_s17, %s2298_s18  }
  0x45   :  { %s2301_s10 = smov [#allocation7]   ;;  %s2302_s13 = smov [#allocation10]  }
  0x46   :  { %s47_s11 = sshll.u32 %s2301_s10, 4  ;;  %s71_s14 = sshll.u32 %s2302_s13, 4  ;;  %s48_s11 = int_to_ptr.vmem [resolvable:$true] %s47_s11  ;;  %s2426_s14 = int_to_ptr.vmem [resolvable:$true] %s71_s14 }
  0x47   :  { %s2197_s19 = scalar_lea.hbm %s2701_s2, 256 }
  0x48   :  { %p2198_p4 = scmp.ne.s32.totalorder %s2701_s2, %s2197_s19  ;;  %p2201_p5 = scmp.lt.u32.totalorder %s2197_s19, %s2701_s2 }
  0x4a   :  { %p2203_p6 = pnand %p2201_p5, %p2198_p4 }
  0x4c   :  { %2206 = shalt.err (!%p2203_p6)
}
  0x4d   :  { %s2207_s0 = scalar_lea.vmem %s48_s11, 256  ;;  %p2212_p8 = scmp.lt.s32.totalorder %s48_s11, %s48_s11 }
  0x4e   :  { %p2208_p7 = scmp.ne.s32.totalorder %s48_s11, %s2207_s0  ;;  %p2213_p9 = scmp.lt.s32.totalorder %s2207_s0, %s2207_s0 }
  0x50   :  { %p2214_p10 = por %p2213_p9, %p2212_p8 }
  0x52   :  { %p2215_p11 = pnand %p2214_p10, %p2208_p7 }
  0x54   :  { %2218 = shalt.err (!%p2215_p11)
}
  0x55   :  { %53 = dma.hbm_to_vmem [thread:$0]  %s2701_s2, 256, %s48_s11, [#allocation6], %s2297_s17, %s2297_s17, %s2298_s18  }
  0x56   :  { %s2219_s25 = scalar_lea.hbm %s2703_s4, 512 }
  0x57   :  { %p2220_p12 = scmp.ne.s32.totalorder %s2703_s4, %s2219_s25  ;;  %p2223_p13 = scmp.lt.u32.totalorder %s2219_s25, %s2703_s4 }
  0x59   :  { %p2225_p0 = pnand %p2223_p13, %p2220_p12 }
  0x5b   :  { %2228 = shalt.err (!%p2225_p0)
}
  0x5c   :  { %s2229_s28 = scalar_lea.vmem %s2426_s14, 512  ;;  %p2234_p2 = scmp.lt.s32.totalorder %s2426_s14, %s2426_s14 }
  0x5d   :  { %p2230_p1 = scmp.ne.s32.totalorder %s2426_s14, %s2229_s28  ;;  %p2235_p3 = scmp.lt.s32.totalorder %s2229_s28, %s2229_s28 }
  0x5f   :  { %p2236_p4 = por %p2235_p3, %p2234_p2 }
  0x61   :  { %p2237_p5 = pnand %p2236_p4, %p2230_p1 }
  0x63   :  { %2240 = shalt.err (!%p2237_p5)
}
  0x64   :  { %77 = dma.hbm_to_vmem [thread:$0]  %s2703_s4, 512, %s2426_s14, [#allocation9], %s2297_s17, %s2297_s17, %s2298_s18  }
  0x65   :  { %s2303_s9 = smov [#allocation13]   ;;  %s2241_s15 = scalar_lea.hbm %s2705_s6, 512 }
  0x66   :  { %s95_s10 = sshll.u32 %s2303_s9, 4  ;;  %p2242_p6 = scmp.ne.s32.totalorder %s2705_s6, %s2241_s15  ;;  %s96_s10 = int_to_ptr.vmem [resolvable:$true] %s95_s10 }
  0x67   :  { %p2245_p7 = scmp.lt.u32.totalorder %s2241_s15, %s2705_s6 }
  0x69   :  { %p2247_p8 = pnand %p2245_p7, %p2242_p6 }
  0x6b   :  { %2250 = shalt.err (!%p2247_p8)
}
  0x6c   :  { %s2251_s3 = scalar_lea.vmem %s96_s10, 512  ;;  %p2256_p10 = scmp.lt.s32.totalorder %s96_s10, %s96_s10 }
  0x6d   :  { %p2252_p9 = scmp.ne.s32.totalorder %s96_s10, %s2251_s3  ;;  %p2257_p11 = scmp.lt.s32.totalorder %s2251_s3, %s2251_s3 }
  0x6f   :  { %p2258_p12 = por %p2257_p11, %p2256_p10 }
  0x71   :  { %p2259_p13 = pnand %p2258_p12, %p2252_p9 }
  0x73   :  { %2262 = shalt.err (!%p2259_p13)
}
  0x74   :  { %101 = dma.hbm_to_vmem [thread:$0]  %s2705_s6, 512, %s96_s10, [#allocation12], %s2297_s17, %s2297_s17, %s2298_s18  }
  0x75   :  { %2285 = dma.done.wait [#allocation3], 256  }
  0x76   :  { %2286 = vsyncadd [#allocation3], 4294967040 }
  0x77   :  { %2287 = dma.done.wait [#allocation6], 512  }
  0x78   :  { %2288 = vsyncadd [#allocation6], 4294966784 }
  0x79   :  { %2289 = dma.done.wait [#allocation9], 1024  }
  0x7a   :  { %2290 = vsyncadd [#allocation9], 4294966272 }
  0x7b   :  { %2291 = dma.done.wait [#allocation12], 1024  }
  0x7c   :  { %2292 = vsyncadd [#allocation12], 4294966272  ;;  %v131_v0 = vld [vmem:[#allocation8] sm:$0xff]  ;;  %v132_v1 = vld [vmem:[#allocation8 + $0x8] sm:$0xff]  ;;  %vm135_vm0 = vcmask 261120   ;;  %v2304_v16 = vmov 0.0   ;;  %v389_v17 = vlaneseq }
  0x7d   :  { %v219_v2 = vld [vmem:[#allocation10] sm:$0xff]  ;;  %v2021_v3 = vpack.c.bf16 %v132_v1, %v131_v0  ;;  %v220_v4 = vld [vmem:[#allocation10 + $0x8] sm:$0xff]  ;;  %v133_v5 = vld [vmem:[#allocation8 + $0x10] sm:$0xff]  ;;  %vm2305_vm1 = vmmov 0   ;;  %vm548_vm12 = vcmask 64512   ;;  %s2306_s0 = smov [#allocation14]  }
  0x7e   :  { %v134_v6 = vld [vmem:[#allocation8 + $0x18] sm:$0xff]  ;;  %v2029_v7 = vpack.c.bf16 %v220_v4, %v219_v2  ;;  %v221_v9 = vld [vmem:[#allocation10 + $0x10] sm:$0xff]  ;;  %v127_v13 = vld [vmem:[#allocation5] sm:$0xff]  ;;  %v2485_v18 = vand.u32 127, %v389_v17  ;;  %s1785_s12 = sshll.u32 %s2306_s0, 4  ;;  %s1786_s12 = int_to_ptr.vmem [resolvable:$true] %s1785_s12 }
  0x7f   :  { %v2025_v8 = vpack.c.bf16 %v134_v6, %v133_v5  ;;  %v222_v10 = vld [vmem:[#allocation10 + $0x18] sm:$0xff]  ;;  %v125_v11 = vld [vmem:[#allocation2] sm:$0xff]  ;;  %2022 = vmatprep.subr.bf16.mxu0 %v2021_v3  ;;  %1916 = vmatprep.mubr.msk.f32.mxu1 %vm135_vm0, %v127_v13  ;;  %v128_v15 = vld [vmem:[#allocation5 + $0x8] sm:$0xff]  ;;  %s2263_s22 = scalar_lea.vmem %s1786_s12, 256  ;;  %p2268_p1 = scmp.lt.s32.totalorder %s1786_s12, %s1786_s12 }
  0x80   :  { %v2033_v12 = vpack.c.bf16 %v222_v10, %v221_v9  ;;  %1905 = vmatprep.mubr.msk.f32.mxu0 %vm135_vm0, %v125_v11  ;;  %2030 = vmatprep.subr.bf16.mxu1 %v2029_v7  ;;  %v126_v14 = vld [vmem:[#allocation2 + $0x8] sm:$0xff]  ;;  %vm1040_vm2 = vcmp.ge.s32.totalorder %v2485_v18, 16  ;;  %vm1041_vm3 = vcmp.lt.s32.totalorder %v2485_v18, 24  ;;  %vm1363_vm4 = vcmp.ge.s32.totalorder %v2485_v18, 24  ;;  %v304_v36 = vld [vmem:[#allocation11] sm:$0xff]  ;;  %v305_v37 = vld [vmem:[#allocation11 + $0x8] sm:$0xff]  ;;  %p2264_p0 = scmp.ne.s32.totalorder %s1786_s12, %s2263_s22  ;;  %p2269_p2 = scmp.lt.s32.totalorder %s2263_s22, %s2263_s22 }
  0x81   :  { %2024 = vmatpush3.bf16.msra.mxu0 %v2021_v3  ;;  %2032 = vmatpush3.bf16.msra.mxu1 %v2029_v7  ;;  %vm1364_vm5 = vcmp.lt.s32.totalorder %v2485_v18, 32  ;;  %vm2491_vm6 = vmand %vm1040_vm2, %vm1041_vm3  ;;  %vm392_vm8 = vcmp.lt.s32.totalorder %v2485_v18, 8  ;;  %vm573_vm9 = vcmp.ge.s32.totalorder %v2485_v18, 8  ;;  %vm574_vm10 = vcmp.lt.s32.totalorder %v2485_v18, 16  ;;  %v306_v38 = vld [vmem:[#allocation11 + $0x10] sm:$0xff]  ;;  %v307_v40 = vld [vmem:[#allocation11 + $0x18] sm:$0xff] }
  0x82   :  { %2026 = vmatprep.subr.bf16.mxu0 %v2025_v8  ;;  %2034 = vmatprep.subr.bf16.mxu1 %v2033_v12  ;;  %vm2495_vm7 = vmand %vm1363_vm4, %vm1364_vm5  ;;  %v2037_v39 = vpack.c.bf16 %v305_v37, %v304_v36  ;;  %v129_v41 = vld [vmem:[#allocation7] sm:$0xff]  ;;  %v2041_v42 = vpack.c.bf16 %v307_v40, %v306_v38  ;;  %v130_v43 = vld [vmem:[#allocation7 + $0x8] sm:$0xff]  ;;  %p2270_p3 = por %p2269_p2, %p2268_p1 }
  0x83   :  { %vm2538_vm11 = vmand %vm573_vm9, %vm574_vm10 }
  0x84   :  { %p2271_p4 = pnand %p2270_p3, %p2264_p0 }
  0x85   :  { %2028 = vmatpush3.bf16.msra.mxu0 %v2025_v8  ;;  %2036 = vmatpush3.bf16.msra.mxu1 %v2033_v12 }
  0x86   :  { %1930 = vmatprep.subr.mxu1 %v2304_v16  ;;  %2038 = vmatprep.subr.bf16.mxu0 %v2037_v39 }
  0x88   :  { %1906 = vmatmul.mubr.msk.f32.vlgmr.msra.gmra.mrb[0].mxu0 %vm135_vm0, %v126_v14  ;;  %1917 = vmatmul.mubr.msk.f32.vlgmr.msra.gmra.mrb[0].mxu1 %vm135_vm0, %v128_v15 }
  0x89   :  { %1932 = vmatprep.mubr.msk.f32.mxu1 %vm2305_vm1, %v2304_v16  ;;  %1927 = vmatprep.mubr.msk.f32.mxu0 %vm135_vm0, %v129_v41 }
  0x8a   :  { %2040 = vmatpush3.bf16.msra.mxu0 %v2037_v39 }
  0x8b   :  { %2042 = vmatprep.subr.bf16.mxu0 %v2041_v42 }
  0x8e   :  { %2044 = vmatpush3.bf16.msra.mxu0 %v2041_v42 }
  0x8f   :  { %1950 = vmatprep.subr.mxu0 %v2304_v16 }
  0x91   :  { %1928 = vmatmul.mubr.msk.f32.vlgmr.msra.gmra.mrb[2].mxu0 %vm135_vm0, %v130_v43 }
  0x92   :  { %1952 = vmatprep.mubr.msk.f32.mxu0 %vm2305_vm1, %v2304_v16 }
 0x15b   :  { %v1907_v20 = vpop.f32.mrb[0].mxu0  ;;  %v2501_v23 = vpop.f32.mrb[0].mxu1 }
 0x15c   :  { %v2499_v22 = vmul.f32 0.35355338, %v1907_v20  ;;  %v208_v24 = vpop.f32.mrb[1].mxu0  ;;  %v2506_v26 = vpop.f32.mrb[1].mxu1 }
 0x15d   :  { %v2504_v25 = vmul.f32 0.35355338, %v208_v24  ;;  %1931 = vmatpush3.xpose.msk.msra.mxu1 %vm135_vm0, %v2506_v26 }
 0x15e   :  { %v1044_v27 = vsel %vm2491_vm6, %v2499_v22, 0.0  ;;  %v1367_v28 = vsel %vm2495_vm7, %v2499_v22, 0.0  ;;  %1935 = vmatprep.subr.mxu1 %v2304_v16  ;;  %v395_v32 = vsel %vm392_vm8, %v2499_v22, 0.0  ;;  %v577_v35 = vsel %vm2538_vm11, %v2499_v22, 0.0 }
 0x15f   :  { %v394_v29 = vsel %vm392_vm8, %v2504_v25, 0.0  ;;  %v1043_v30 = vsel %vm2491_vm6, %v2504_v25, 0.0  ;;  %v1366_v31 = vsel %vm2495_vm7, %v2504_v25, 0.0  ;;  %v576_v34 = vsel %vm2538_vm11, %v2504_v25, 0.0 }
 0x160   :  { %1933 = vmatmul.mubr.msk.f32.vlgmr.msra.gmra.mrb[2].mxu1 %vm135_vm0, %v394_v29 }
 0x161   :  { %1936 = vmatpush3.xpose.msk.msra.mxu1 %vm135_vm0, %v2501_v23  ;;  %1937 = vmatprep.mubr.msk.f32.mxu1 %vm2305_vm1, %v2304_v16 }
 0x162   :  { %1940 = vmatprep.subr.mxu1 %v2304_v16 }
 0x164   :  { %1938 = vmatmul.mubr.msk.f32.vlgmr.msra.gmra.mrb[4].mxu1 %vm135_vm0, %v395_v32  ;;  %v2575_v12 = vpop.f32.mrb[2].mxu0 }
 0x165   :  { %1941 = vmatpush3.xpose.msk.msra.mxu1 %vm135_vm0, %v2506_v26  ;;  %1942 = vmatprep.mubr.msk.f32.mxu1 %vm2305_vm1, %v2304_v16  ;;  %v2577_v13 = vpop.f32.mrb[3].mxu0 }
 0x166   :  { %1945 = vmatprep.subr.mxu1 %v2304_v16  ;;  %1951 = vmatpush3.msk.msra.mxu0 %vm2538_vm11, %v2577_v13 }
 0x167   :  { %1960 = vmatprep.subr.mxu0 %v2304_v16 }
 0x168   :  { %1943 = vmatmul.mubr.msk.f32.vlgmr.msra.gmra.mrb[6].mxu1 %vm135_vm0, %v576_v34 }
 0x169   :  { %1946 = vmatpush3.xpose.msk.msra.mxu1 %vm135_vm0, %v2501_v23  ;;  %1947 = vmatprep.mubr.msk.f32.mxu1 %vm2305_vm1, %v2304_v16 }
 0x16a   :  { %1955 = vmatprep.subr.mxu1 %v2304_v16 }
 0x16c   :  { %1948 = vmatmul.mubr.msk.f32.vlgmr.msra.gmra.mrb[8].mxu1 %vm135_vm0, %v577_v35 }
 0x16d   :  { %1957 = vmatprep.mubr.msk.f32.mxu1 %vm2305_vm1, %v2304_v16  ;;  %1956 = vmatpush3.msk.msra.mxu1 %vm2538_vm11, %v2575_v12 }
 0x16e   :  { %1965 = vmatprep.subr.mxu1 %v2304_v16 }
 0x233   :  { %v468_v44 = vpop.f32.mrb[2].mxu1 }
 0x234   :  { %v1934_v45 = vpop.f32.mrb[3].mxu1  ;;  %v549_v46 = vsel %vm548_vm12, %v468_v44, -inf }
 0x235   :  { %550 = vmax.xlane.f32.xlu1 %v549_v46 }
 0x237   :  { %v544_v47 = vpop.f32.mrb[4].mxu1 }
 0x238   :  { %v1939_v48 = vpop.f32.mrb[5].mxu1  ;;  %v552_v49 = vsel %vm548_vm12, %v544_v47, -inf }
 0x239   :  { %553 = vmax.xlane.f32.xlu1 %v552_v49 }
 0x23b   :  { %v647_v50 = vpop.f32.mrb[6].mxu1 }
 0x23c   :  { %v1944_v51 = vpop.f32.mrb[7].mxu1  ;;  %v724_v52 = vsel %vm548_vm12, %v647_v50, -inf }
 0x23d   :  { %725 = vmax.xlane.f32.xlu0 %v724_v52 }
 0x23f   :  { %v720_v53 = vpop.f32.mrb[8].mxu1 }
 0x240   :  { %v1949_v54 = vpop.f32.mrb[9].mxu1  ;;  %v727_v55 = vsel %vm548_vm12, %v720_v53, -inf }
 0x241   :  { %728 = vmax.xlane.f32.xlu0 %v727_v55 }
 0x2c2   :  { %v551_v56 = vpop.xlane.xlu1 %550 }
 0x2c3   :  { %v555_v57 = vsub.f32 %v468_v44, %v551_v56 }
 0x2c5   :  { %v557_v61 = vmul.f32 1.442695, %v555_v57 }
 0x2c6   :  { %v554_v58 = vpop.xlane.xlu1 %553 }
 0x2c7   :  { %v556_v62 = vsub.f32 %v544_v47, %v554_v58 }
 0x2c9   :  { %v559_v2 = vmul.f32 1.442695, %v556_v62 }
 0x2ca   :  { %v726_v59 = vpop.xlane.xlu0 %725 }
 0x2cb   :  { %v730_v60 = vsub.f32 %v647_v50, %v726_v59 }
 0x2cd   :  { %v732_v63 = vmul.f32 1.442695, %v730_v60 }
 0x2ce   :  { %v729_v0 = vpop.xlane.xlu0 %728 }
 0x2cf   :  { %2077 = vpow2.f32 %v732_v63  ;;  %v731_v1 = vsub.f32 %v720_v53, %v729_v0  ;;  %v1686_v0 = vld [vmem:[#allocation13] sm:$0xff] }
 0x2d0   :  { %2079 = vpow2.f32 %v557_v61 }
 0x2d1   :  { %v734_v3 = vmul.f32 1.442695, %v731_v1  ;;  %v1687_v1 = vld [vmem:[#allocation13 + $0x8] sm:$0xff] }
 0x2d3   :  { %2081 = vpow2.f32 %v734_v3 }
 0x2d4   :  { %2083 = vpow2.f32 %v559_v2  ;;  %v2045_v2 = vpack.c.bf16 %v1687_v1, %v1686_v0 }
 0x2d9   :  { %v2078_v4 = vpop.eup %2077 }
 0x2da   :  { %v736_v5 = vsel %vm548_vm12, %v2078_v4, 0.0  ;;  %v2080_v6 = vpop.eup %2079 }
 0x2db   :  { %737 = vadd.xlane.f32.xlu0 %v736_v5  ;;  %v561_v8 = vsel %vm548_vm12, %v2080_v6, 0.0 }
 0x2dd   :  { %v2082_v7 = vpop.eup %2081 }
 0x2de   :  { %v739_v9 = vsel %vm548_vm12, %v2082_v7, 0.0  ;;  %v2084_v10 = vpop.eup %2083 }
 0x2df   :  { %562 = vadd.xlane.f32.xlu0 %v561_v8  ;;  %740 = vadd.xlane.f32.xlu1 %v739_v9  ;;  %v564_v11 = vsel %vm548_vm12, %v2084_v10, 0.0  ;;  %v1688_v9 = vld [vmem:[#allocation13 + $0x10] sm:$0xff] }
 0x2e3   :  { %565 = vadd.xlane.f32.xlu1 %v564_v11 }
 0x368   :  { %v738_v14 = vpop.xlane.xlu0 %737 }
 0x369   :  { %2085 = vrcp.f32 %v738_v14 }
 0x36c   :  { %v741_v15 = vpop.xlane.xlu1 %740  ;;  %v563_v17 = vpop.xlane.xlu0 %562 }
 0x36d   :  { %2087 = vrcp.f32 %v741_v15 }
 0x36e   :  { %2089 = vrcp.f32 %v563_v17  ;;  %v1838_v17 = vld [vmem:[%s2706_s7] ss:$0 sm:$0xff] }
 0x370   :  { %v566_v20 = vpop.xlane.xlu1 %565 }
 0x371   :  { %2091 = vrcp.f32 %v566_v20 }
 0x373   :  { %v2086_v24 = vpop.eup %2085 }
 0x374   :  { %v744_v29 = vmul.f32 %v2086_v24, %v2078_v4 }
 0x376   :  { %1953 = vmatmul.mubr.msk.f32.vlgmr.msra.gmra.mrb[4].mxu0 %vm548_vm12, %v744_v29 }
 0x377   :  { %v2088_v32 = vpop.eup %2087  ;;  %1961 = vmatpush3.msk.msra.mxu0 %vm392_vm8, %v2577_v13  ;;  %1962 = vmatprep.mubr.msk.f32.mxu0 %vm2305_vm1, %v2304_v16 }
 0x378   :  { %v745_v33 = vmul.f32 %v2088_v32, %v2082_v7  ;;  %1970 = vmatprep.subr.mxu0 %v2304_v16  ;;  %v2090_v34 = vpop.eup %2089 }
 0x379   :  { %v569_v35 = vmul.f32 %v2090_v34, %v2080_v6 }
 0x37a   :  { %1958 = vmatmul.mubr.msk.f32.vlgmr.msra.gmra.mrb[10].mxu1 %vm548_vm12, %v745_v33 }
 0x37b   :  { %1966 = vmatpush3.msk.msra.mxu1 %vm392_vm8, %v2575_v12  ;;  %1967 = vmatprep.mubr.msk.f32.mxu1 %vm2305_vm1, %v2304_v16  ;;  %v2092_v36 = vpop.eup %2091 }
 0x37c   :  { %1975 = vmatprep.subr.mxu1 %v2304_v16  ;;  %v570_v37 = vmul.f32 %v2092_v36, %v2084_v10  ;;  %v1689_v10 = vld [vmem:[#allocation13 + $0x18] sm:$0xff] }
 0x37d   :  { %v2049_v11 = vpack.c.bf16 %v1689_v10, %v1688_v9 }
 0x37e   :  { %1963 = vmatmul.mubr.msk.f32.vlgmr.msra.gmra.mrb[4].mxu0 %vm548_vm12, %v569_v35 }
 0x37f   :  { %1971 = vmatpush3.xpose.msk.msra.mxu0 %vm135_vm0, %v2506_v26  ;;  %1972 = vmatprep.mubr.msk.f32.mxu0 %vm2305_vm1, %v2304_v16 }
 0x380   :  { %1980 = vmatprep.subr.mxu0 %v2304_v16 }
 0x382   :  { %1968 = vmatmul.mubr.msk.f32.vlgmr.msra.gmra.mrb[10].mxu1 %vm548_vm12, %v570_v37  ;;  %1973 = vmatmul.mubr.msk.f32.vlgmr.msra.gmra.mrb[6].mxu0 %vm135_vm0, %v1043_v30 }
 0x383   :  { %1976 = vmatpush3.xpose.msk.msra.mxu1 %vm135_vm0, %v2501_v23  ;;  %1981 = vmatpush3.msk.msra.mxu0 %vm2491_vm6, %v2577_v13 }
 0x384   :  { %1977 = vmatprep.mubr.msk.f32.mxu1 %vm2305_vm1, %v2304_v16  ;;  %1985 = vmatprep.subr.mxu1 %v2304_v16 }
 0x385   :  { %1982 = vmatprep.mubr.msk.f32.mxu0 %vm2305_vm1, %v2304_v16  ;;  %1990 = vmatprep.subr.mxu0 %v2304_v16 }
 0x386   :  { %1978 = vmatmul.mubr.msk.f32.vlgmr.msra.gmra.mrb[12].mxu1 %vm135_vm0, %v1044_v27 }
 0x387   :  { %1986 = vmatpush3.msk.msra.mxu1 %vm2491_vm6, %v2575_v12  ;;  %1987 = vmatprep.mubr.msk.f32.mxu1 %vm2305_vm1, %v2304_v16 }
 0x388   :  { %1995 = vmatprep.subr.mxu1 %v2304_v16 }
 0x455   :  { %v1114_v18 = vpop.f32.mrb[6].mxu0 }
 0x456   :  { %v1974_v30 = vpop.f32.mrb[7].mxu0  ;;  %v1191_v38 = vsel %vm548_vm12, %v1114_v18, -inf }
 0x457   :  { %1192 = vmax.xlane.f32.xlu0 %v1191_v38 }
 0x459   :  { %v1187_v39 = vpop.f32.mrb[12].mxu1 }
 0x45a   :  { %v1979_v40 = vpop.f32.mrb[13].mxu1  ;;  %v1194_v41 = vsel %vm548_vm12, %v1187_v39, -inf }
 0x45b   :  { %1195 = vmax.xlane.f32.xlu1 %v1194_v41 }
 0x4e4   :  { %v1193_v27 = vpop.xlane.xlu0 %1192 }
 0x4e5   :  { %v1197_v42 = vsub.f32 %v1114_v18, %v1193_v27 }
 0x4e7   :  { %v1199_v43 = vmul.f32 1.442695, %v1197_v42 }
 0x4e8   :  { %v1196_v19 = vpop.xlane.xlu1 %1195 }
 0x4e9   :  { %2093 = vpow2.f32 %v1199_v43  ;;  %v1198_v44 = vsub.f32 %v1187_v39, %v1196_v19 }
 0x4eb   :  { %v1201_v45 = vmul.f32 1.442695, %v1198_v44 }
 0x4ed   :  { %2095 = vpow2.f32 %v1201_v45 }
 0x4f3   :  { %v2094_v46 = vpop.eup %2093 }
 0x4f4   :  { %v1203_v47 = vsel %vm548_vm12, %v2094_v46, 0.0 }
 0x4f5   :  { %1204 = vadd.xlane.f32.xlu0 %v1203_v47 }
 0x4f7   :  { %v2096_v48 = vpop.eup %2095 }
 0x4f8   :  { %v1206_v49 = vsel %vm548_vm12, %v2096_v48, 0.0 }
 0x4f9   :  { %1207 = vadd.xlane.f32.xlu1 %v1206_v49 }
 0x582   :  { %v1205_v50 = vpop.xlane.xlu0 %1204 }
 0x583   :  { %2097 = vrcp.f32 %v1205_v50 }
 0x586   :  { %v1208_v51 = vpop.xlane.xlu1 %1207 }
 0x587   :  { %2099 = vrcp.f32 %v1208_v51 }
 0x58d   :  { %v2098_v52 = vpop.eup %2097 }
 0x58e   :  { %v1211_v53 = vmul.f32 %v2098_v52, %v2094_v46 }
 0x590   :  { %1983 = vmatmul.mubr.msk.f32.vlgmr.msra.gmra.mrb[4].mxu0 %vm548_vm12, %v1211_v53 }
 0x591   :  { %v2100_v54 = vpop.eup %2099  ;;  %1991 = vmatpush3.xpose.msk.msra.mxu0 %vm135_vm0, %v2506_v26  ;;  %1992 = vmatprep.mubr.msk.f32.mxu0 %vm2305_vm1, %v2304_v16 }
 0x592   :  { %v1212_v55 = vmul.f32 %v2100_v54, %v2096_v48  ;;  %2000 = vmatprep.subr.mxu0 %v2304_v16 }
 0x594   :  { %1988 = vmatmul.mubr.msk.f32.vlgmr.msra.gmra.mrb[10].mxu1 %vm548_vm12, %v1212_v55  ;;  %1993 = vmatmul.mubr.msk.f32.vlgmr.msra.gmra.mrb[8].mxu0 %vm135_vm0, %v1366_v31 }
 0x595   :  { %1996 = vmatpush3.xpose.msk.msra.mxu1 %vm135_vm0, %v2501_v23  ;;  %2001 = vmatpush3.msk.msra.mxu0 %vm2495_vm7, %v2577_v13 }
 0x596   :  { %1997 = vmatprep.mubr.msk.f32.mxu1 %vm2305_vm1, %v2304_v16  ;;  %2005 = vmatprep.subr.mxu1 %v2304_v16 }
 0x597   :  { %2002 = vmatprep.mubr.msk.f32.mxu0 %vm2305_vm1, %v2304_v16  ;;  %2046 = vmatprep.subr.bf16.mxu0 %v2045_v2 }
 0x598   :  { %1998 = vmatmul.mubr.msk.f32.vlgmr.msra.gmra.mrb[14].mxu1 %vm135_vm0, %v1367_v28 }
 0x599   :  { %2006 = vmatpush3.msk.msra.mxu1 %vm2495_vm7, %v2575_v12  ;;  %2007 = vmatprep.mubr.msk.f32.mxu1 %vm2305_vm1, %v2304_v16 }
 0x667   :  { %v1437_v23 = vpop.f32.mrb[8].mxu0 }
 0x668   :  { %v1994_v25 = vpop.f32.mrb[9].mxu0  ;;  %v1514_v26 = vsel %vm548_vm12, %v1437_v23, -inf }
 0x669   :  { %1515 = vmax.xlane.f32.xlu0 %v1514_v26 }
 0x66b   :  { %v1510_v31 = vpop.f32.mrb[14].mxu1 }
 0x66c   :  { %v1999_v56 = vpop.f32.mrb[15].mxu1  ;;  %v1517_v57 = vsel %vm548_vm12, %v1510_v31, -inf }
 0x66d   :  { %1518 = vmax.xlane.f32.xlu1 %v1517_v57 }
 0x6f6   :  { %v1516_v22 = vpop.xlane.xlu0 %1515 }
 0x6f7   :  { %v1520_v58 = vsub.f32 %v1437_v23, %v1516_v22 }
 0x6f9   :  { %v1522_v28 = vmul.f32 1.442695, %v1520_v58 }
 0x6fa   :  { %v1519_v59 = vpop.xlane.xlu1 %1518 }
 0x6fb   :  { %2101 = vpow2.f32 %v1522_v28  ;;  %v1521_v21 = vsub.f32 %v1510_v31, %v1519_v59 }
 0x6fd   :  { %v1524_v60 = vmul.f32 1.442695, %v1521_v21 }
 0x6ff   :  { %2103 = vpow2.f32 %v1524_v60 }
 0x705   :  { %v2102_v61 = vpop.eup %2101 }
 0x706   :  { %v1526_v16 = vsel %vm548_vm12, %v2102_v61, 0.0 }
 0x707   :  { %1527 = vadd.xlane.f32.xlu0 %v1526_v16 }
 0x709   :  { %v2104_v62 = vpop.eup %2103 }
 0x70a   :  { %v1529_v63 = vsel %vm548_vm12, %v2104_v62, 0.0 }
 0x70b   :  { %1530 = vadd.xlane.f32.xlu1 %v1529_v63 }
 0x794   :  { %v1528_v3 = vpop.xlane.xlu0 %1527 }
 0x795   :  { %2105 = vrcp.f32 %v1528_v3 }
 0x798   :  { %v1531_v4 = vpop.xlane.xlu1 %1530 }
 0x799   :  { %2107 = vrcp.f32 %v1531_v4 }
 0x79f   :  { %v2106_v5 = vpop.eup %2105 }
 0x7a0   :  { %v1534_v6 = vmul.f32 %v2106_v5, %v2102_v61 }
 0x7a2   :  { %2003 = vmatmul.mubr.msk.f32.vlgmr.msra.gmra.mrb[4].mxu0 %vm548_vm12, %v1534_v6 }
 0x7a3   :  { %v2108_v7 = vpop.eup %2107  ;;  %2048 = vmatpush3.bf16.msra.mxu0 %v2045_v2 }
 0x7a4   :  { %v1535_v8 = vmul.f32 %v2108_v7, %v2104_v62  ;;  %2050 = vmatprep.subr.bf16.mxu0 %v2049_v11 }
 0x7a6   :  { %2008 = vmatmul.mubr.msk.f32.vlgmr.msra.gmra.mrb[10].mxu1 %vm548_vm12, %v1535_v8 }
 0x7a7   :  { %2052 = vmatpush3.bf16.msra.mxu0 %v2049_v11 }
 0x875   :  { %v1607_v12 = vpop.f32.mrb[4].mxu0 }
 0x876   :  { %v2004_v13 = vpop.f32.mrb[5].mxu0  ;;  %2018 = vmatprep.mubr.msk.f32.mxu0 %vm135_vm0, %v1607_v12 }
 0x879   :  { %v1680_v14 = vpop.f32.mrb[10].mxu1 }
 0x87a   :  { %v2009_v15 = vpop.f32.mrb[11].mxu1  ;;  %2019 = vmatmul.mubr.msk.f32.vlgmr.msra.gmra.mrb[10].mxu0 %vm135_vm0, %v1680_v14 }
 0x94d   :  { %v2020_v20 = vpop.f32.mrb[10].mxu0 }
 0x94e   :  { %v1775_v24 = vadd.f32 %v2020_v20, %v1838_v17  ;;  %v1769_v29 = vpop.f32.mrb[11].mxu0 }
 0x94f   :  { %v1770_v32 = vadd.f32 %v1838_v17, %v1769_v29 }
 0x950   :  { %1779 = vst.msk [vmem:[#allocation14 + $0x8] sm:$0xff] %vm135_vm0, %v1775_v24 }
 0x951   :  { %1778 = vst.msk [vmem:[#allocation14] sm:$0xff] %vm135_vm0, %v1770_v32 }
 0x952   :  { %2274 = shalt.err (!%p2271_p4)
}
 0x953   :  { %s2275_s24 = scalar_lea.hbm %s2707_s8, 256 }
 0x954   :  { %p2276_p5 = scmp.ne.s32.totalorder %s2707_s8, %s2275_s24  ;;  %p2279_p6 = scmp.lt.u32.totalorder %s2275_s24, %s2707_s8 }
 0x956   :  { %p2281_p7 = pnand %p2279_p6, %p2276_p5 }
 0x958   :  { %2284 = shalt.err (!%p2281_p7)
}
 0x959   :  { %1791 = dma.vmem_to_hbm [thread:$0]  %s1786_s12, 256, %s2707_s8, [#allocation4], %s2297_s17, %s2297_s17, %s2298_s18  }
 0x95a   :  { %2293 = dma.done.wait [#allocation4], 256  }
 0x95b   :  { %2294 = vsyncadd [#allocation4], 4294967040 }
 0x95c   :  { %1795 = vsyncpa [#allocation3], 1 }
 0x95d   :  { %1796 = vsyncpa [#allocation6], 1 }
 0x95e   :  { %1797 = vsyncpa [#allocation9], 1 }
 0x95f   :  { %1798 = vsyncpa [#allocation12], 1 }
 0x960   :  { %1799 = vsyncpa [#allocation4], 1 }

</bundles_post_ra>
